<compile_context>
chip_gen: v7x
topology: tpu7x:2x2x1
jax: 0.10.0
libtpu: 0.0.40
codegen_flags: <defaults>
</compile_context>

<pallas_src>
import functools

import jax
import jax.numpy as jnp
from jax.experimental import pallas as pl
from jax.experimental.pallas import tpu as pltpu

MANO_PARA_DIM = 3 * 2 + 15 * 3 + 10 + 3  # = 64 (6D root rot + 45 pose + 10 beta + 3 proj)


def _round_up(n, m):
    return (n + m - 1) // m * m


def _layout(feat_dim):
    """Static, 128-lane-aligned layout of the fused activation row.

    [ fl (F) | fr (F) | offset_init (3), bias-one (1) | mano_l_init (64) | mano_r_init (64) ]
      slot 0   slot 1   slot 2 (128 wide)               slot 3 (128)       slot 4 (128)
    """
    f_pad = _round_up(feat_dim, 128)
    s_fr = f_pad
    s_misc = 2 * f_pad
    s_ml = s_misc + 128
    s_mr = s_ml + 128
    return {
        "f_pad": f_pad,
        "s_fr": s_fr,
        "s_misc": s_misc,          # offset_init at +0..3, bias-one at +3
        "s_ml": s_ml,
        "s_mr": s_mr,
        "bias_row": s_misc + 3,
        "off_rows": s_ml,          # offset head only reads rows [0, s_ml)
        "din_pad": s_mr + 128,
    }


# ----------------------------- Pallas kernel ------------------------------ #

def _fused_heads_kernel(fl_ref, fr_ref, off_ref, ml_ref, mr_ref,
                        wm_ref, wo_ref, om_ref, oo_ref, x_ref,
                        *, batch, s_fr, s_misc, s_ml, s_mr):
    f = fl_ref.shape[1]
    m = ml_ref.shape[1]

    # Assemble the fused activation row in a VMEM scratch (f32).  Zero-init so
    # unused slot tails multiply zero weight rows; every piece starts at a
    # 128-lane-aligned offset -> plain masked stores, no lane shifts.
    x_ref[...] = jnp.zeros_like(x_ref)
    x_ref[0:batch, 0:f] = fl_ref[...]
    x_ref[0:batch, s_fr:s_fr + f] = fr_ref[...]
    x_ref[0:batch, s_misc:s_misc + 3] = off_ref[...]
    # Constant 1.0 column that folds the biases into the matmul (set for all
    # padded batch rows too; those rows are sliced off in the wrapper).
    x_ref[:, s_misc + 3:s_misc + 4] = jnp.ones((x_ref.shape[0], 1), x_ref.dtype)
    x_ref[0:batch, s_ml:s_ml + m] = ml_ref[...]
    x_ref[0:batch, s_mr:s_mr + m] = mr_ref[...]

    # bf16 MXU matmuls with f32 accumulation; biases arrive via the 1.0 column.
    x = x_ref[...].astype(jnp.bfloat16)
    om_ref[...] = jnp.dot(x, wm_ref[...], preferred_element_type=jnp.float32)
    oo_ref[...] = jnp.dot(x[:, 0:wo_ref.shape[0]], wo_ref[...],
                          preferred_element_type=jnp.float32)


def fused_heads(fl, fr, off, ml, mr, w_mano, w_off):
    """Fused [mano_left|mano_right] + offset linear heads (gridless, one block)."""
    B, F = fl.shape
    lay = _layout(F)
    b_pad = _round_up(B, 8)
    n_mano = w_mano.shape[1]
    n_off = w_off.shape[1]

    kernel = functools.partial(
        _fused_heads_kernel, batch=B,
        s_fr=lay["s_fr"], s_misc=lay["s_misc"], s_ml=lay["s_ml"], s_mr=lay["s_mr"])

    flops = 2 * b_pad * (lay["din_pad"] * n_mano + lay["off_rows"] * n_off)
    bytes_acc = ((w_mano.size + w_off.size) * 2
                 + (fl.size + fr.size + off.size + ml.size + mr.size) * 4
                 + b_pad * (n_mano + n_off) * 4)

    return pl.pallas_call(
        kernel,
        out_shape=(jax.ShapeDtypeStruct((b_pad, n_mano), jnp.float32),
                   jax.ShapeDtypeStruct((b_pad, n_off), jnp.float32)),
        in_specs=[pl.BlockSpec(memory_space=pltpu.MemorySpace.VMEM)] * 7,
        out_specs=[pl.BlockSpec(memory_space=pltpu.MemorySpace.VMEM)] * 2,
        scratch_shapes=[pltpu.VMEM((b_pad, lay["din_pad"]), jnp.float32)],
        cost_estimate=pl.CostEstimate(
            flops=flops, transcendentals=0, bytes_accessed=bytes_acc),
    )(fl, fr, off, ml, mr, w_mano, w_off)


# --------------------------- parameter creation ---------------------------- #

def init_params(key, feat_dim):
    """Synthetic init mirroring RegressorOffset shapes (weights ~ N(0, 0.001)).

    Weights stored pre-transposed as (Din, Dout) so y = x @ W + b.
    """
    ks = jax.random.split(key, 6)
    wstd = 0.001
    m = MANO_PARA_DIM
    return {
        "mano_left_w": wstd * jax.random.normal(ks[0], (feat_dim + m, m), jnp.float32),
        "mano_left_b": 0.01 * jax.random.normal(ks[1], (m,), jnp.float32),
        "mano_right_w": wstd * jax.random.normal(ks[2], (feat_dim + m, m), jnp.float32),
        "mano_right_b": 0.01 * jax.random.normal(ks[3], (m,), jnp.float32),
        "offset_w": wstd * jax.random.normal(ks[4], (feat_dim * 2 + 3, 3), jnp.float32),
        "offset_b": 0.01 * jax.random.normal(ks[5], (3,), jnp.float32),
    }


def fuse_params(params, feat_dim):
    """Build the two block-structured fused weights ONCE, stored in bf16.

    w_mano (Din_pad, 128): cols [0,64) = mano_left, cols [64,128) = mano_right.
    w_off  (off_rows, 8) : cols [0,3)  = offset head.
    Biases live on row `bias_row`, paired with the 1.0 activation column.
    """
    lay = _layout(feat_dim)
    F = feat_dim
    m = MANO_PARA_DIM

    w_mano = jnp.zeros((lay["din_pad"], 2 * m), jnp.float32)
    # mano_left: input = [fl, mano_l_init]
    w_mano = w_mano.at[0:F, 0:m].set(params["mano_left_w"][:F])
    w_mano = w_mano.at[lay["s_ml"]:lay["s_ml"] + m, 0:m].set(params["mano_left_w"][F:])
    w_mano = w_mano.at[lay["bias_row"], 0:m].set(params["mano_left_b"])
    # mano_right: input = [fr, mano_r_init]
    w_mano = w_mano.at[lay["s_fr"]:lay["s_fr"] + F, m:2 * m].set(params["mano_right_w"][:F])
    w_mano = w_mano.at[lay["s_mr"]:lay["s_mr"] + m, m:2 * m].set(params["mano_right_w"][F:])
    w_mano = w_mano.at[lay["bias_row"], m:2 * m].set(params["mano_right_b"])

    w_off = jnp.zeros((lay["off_rows"], 8), jnp.float32)
    # offset: input = [fl, fr, offset_init]
    w_off = w_off.at[0:F, 0:3].set(params["offset_w"][:F])
    w_off = w_off.at[lay["s_fr"]:lay["s_fr"] + F, 0:3].set(params["offset_w"][F:2 * F])
    w_off = w_off.at[lay["s_misc"]:lay["s_misc"] + 3, 0:3].set(params["offset_w"][2 * F:2 * F + 3])
    w_off = w_off.at[lay["bias_row"], 0:3].set(params["offset_b"])

    return {"w_mano": w_mano.astype(jnp.bfloat16),
            "w_off": w_off.astype(jnp.bfloat16)}


# ------------------------------- forward ----------------------------------- #

def regressor_offset_forward(fused, sampled_feat_l, sampled_feat_r,
                             mano_para_l_init, mano_para_r_init, offset_init):
    # TODO(synk): pl.pallas_call has no automatic VJP; wrap fused_heads in a
    # jax.custom_vjp before using this under training.
    B, J, C = sampled_feat_l.shape
    feat_dim = J * C
    m = MANO_PARA_DIM

    fl = sampled_feat_l.reshape(B, feat_dim)
    fr = sampled_feat_r.reshape(B, feat_dim)
    # mano inits are detached in the reference; offset_init is NOT.
    ml = jax.lax.stop_gradient(mano_para_l_init)
    mr = jax.lax.stop_gradient(mano_para_r_init)
    off = jnp.squeeze(offset_init, axis=1)

    om, oo = fused_heads(fl, fr, off, ml, mr, fused["w_mano"], fused["w_off"])

    pd_offset = oo[:B, 0:3]
    pd_mano_para_left = om[:B, 0:m]
    pd_mano_para_right = om[:B, m:2 * m]

    # torch.split(..., [2*3 + 15*3, 10, 3], dim=-1)
    pd_mano_pose_left = pd_mano_para_left[:, :51]
    pd_mano_beta_left = pd_mano_para_left[:, 51:61]
    pd_para_left = pd_mano_para_left[:, 61:64]
    pd_mano_pose_right = pd_mano_para_right[:, :51]
    pd_mano_beta_right = pd_mano_para_right[:, 51:61]
    pd_para_right = pd_mano_para_right[:, 61:64]

    # TODO(synk): ObmanManoLayer (MANO vertex/joint regression) requires external
    # MANO model assets (shapedirs / posedirs / J_regressor); not translated.
    # TODO(synk): projection_batch_xy depends on the MANO layer outputs above,
    # so the uv/xyz outputs are omitted for the same reason.
    return {
        "pd_offset": pd_offset,
        "pd_rel_joint": None,
        "pd_proj_left": pd_para_left,
        "pd_proj_right": pd_para_right,
        "pd_mano_pose_left": pd_mano_pose_left,
        "pd_mano_pose_right": pd_mano_pose_right,
        "pd_mano_beta_left": pd_mano_beta_left,
        "pd_mano_beta_right": pd_mano_beta_right,
        "pd_mano_para_left": pd_mano_para_left,
        "pd_mano_para_right": pd_mano_para_right,
    }


# --------------------------------- main ------------------------------------ #

if __name__ == "__main__":
    key = jax.random.PRNGKey(0)
    kp, k1, k2, k3, k4, k5 = jax.random.split(key, 6)

    # Small shapes: B=2, J=8 sampled joints, C=16 channels -> feat_dim = 128.
    B, J, C = 2, 8, 16
    feat_dim = J * C
    m = MANO_PARA_DIM

    raw_params = init_params(kp, feat_dim)
    fused_params = fuse_params(raw_params, feat_dim)

    sampled_feat_l = jax.random.normal(k1, (B, J, C), jnp.float32)
    sampled_feat_r = jax.random.normal(k2, (B, J, C), jnp.float32)
    mano_para_l_init = jax.random.normal(k3, (B, m), jnp.float32)
    mano_para_r_init = jax.random.normal(k4, (B, m), jnp.float32)
    offset_init = jax.random.normal(k5, (B, 1, 3), jnp.float32)

    fwd = jax.jit(functools.partial(regressor_offset_forward, fused_params))
    out = fwd(sampled_feat_l, sampled_feat_r,
              mano_para_l_init, mano_para_r_init, offset_init)
    jax.block_until_ready(out["pd_offset"])
    jax.block_until_ready(out["pd_mano_para_left"])
    jax.block_until_ready(out["pd_mano_para_right"])

    # Sanity check against a pure-JAX reference using the same bf16 weight /
    # activation rounding (the kernel accumulates in f32, bias folded in bf16).
    def b16(a):
        return a.astype(jnp.bfloat16).astype(jnp.float32)

    def ref_linear(x, w, b):
        return jnp.dot(b16(x), b16(w), precision=jax.lax.Precision.HIGHEST) + b16(b)

    fl = sampled_feat_l.reshape(B, feat_dim)
    fr = sampled_feat_r.reshape(B, feat_dim)
    gl = jnp.concatenate([fl, mano_para_l_init], axis=-1)
    gr = jnp.concatenate([fr, mano_para_r_init], axis=-1)
    g = jnp.concatenate([fl, fr, offset_init[:, 0, :]], axis=-1)

    assert jnp.allclose(out["pd_offset"],
                        ref_linear(g, raw_params["offset_w"], raw_params["offset_b"]),
                        atol=1e-4)
    assert jnp.allclose(out["pd_mano_para_left"],
                        ref_linear(gl, raw_params["mano_left_w"], raw_params["mano_left_b"]),
                        atol=1e-4)
    assert jnp.allclose(out["pd_mano_para_right"],
                        ref_linear(gr, raw_params["mano_right_w"], raw_params["mano_right_b"]),
                        atol=1e-4)

    print("KERNEL_OK")
</pallas_src>

<mosaic_0001>
module attributes {stable_mosaic.version = 11 : i64} {
  func.func @_fused_heads_kernel(%arg0: memref<2x128xf32, #tpu.memory_space<vmem>>, %arg1: memref<2x128xf32, #tpu.memory_space<vmem>>, %arg2: memref<2x3xf32, #tpu.memory_space<vmem>>, %arg3: memref<2x64xf32, #tpu.memory_space<vmem>>, %arg4: memref<2x64xf32, #tpu.memory_space<vmem>>, %arg5: memref<640x128xbf16, #tpu.memory_space<vmem>>, %arg6: memref<384x8xbf16, #tpu.memory_space<vmem>>, %arg7: memref<8x128xf32, #tpu.memory_space<vmem>>, %arg8: memref<8x8xf32, #tpu.memory_space<vmem>>, %arg9: memref<8x640xf32, #tpu.memory_space<vmem>>) attributes {dimension_semantics = [], scalar_prefetch = 0 : i64, scratch_operands = 1 : i64, tpu.core_type = #tpu.core_type<tc>} {
    %cst = arith.constant 0.000000e+00 : f32
    %0 = vector.broadcast %cst : f32 to vector<8x640xf32>
    %c0 = arith.constant 0 : index
    %c0_0 = arith.constant 0 : index
    %1 = vector.load %arg9[%c0, %c0_0] : memref<8x640xf32, #tpu.memory_space<vmem>>, vector<8x640xf32>
    tpu.vector_store %arg9[%c0, %c0_0], %0 {strides = array<i32>} : memref<8x640xf32, #tpu.memory_space<vmem>>, vector<8x640xf32>,
    %c0_1 = arith.constant 0 : index
    %c0_2 = arith.constant 0 : index
    %2 = vector.load %arg0[%c0_1, %c0_2] : memref<2x128xf32, #tpu.memory_space<vmem>>, vector<2x128xf32>
    %c0_3 = arith.constant 0 : index
    %c0_4 = arith.constant 0 : index
    %3 = vector.load %arg9[%c0_3, %c0_4] : memref<8x640xf32, #tpu.memory_space<vmem>>, vector<2x128xf32>
    tpu.vector_store %arg9[%c0_3, %c0_4], %2 {strides = array<i32>} : memref<8x640xf32, #tpu.memory_space<vmem>>, vector<2x128xf32>,
    %c0_5 = arith.constant 0 : index
    %c0_6 = arith.constant 0 : index
    %4 = vector.load %arg1[%c0_5, %c0_6] : memref<2x128xf32, #tpu.memory_space<vmem>>, vector<2x128xf32>
    %c0_7 = arith.constant 0 : index
    %c128 = arith.constant 128 : index
    %5 = vector.load %arg9[%c0_7, %c128] : memref<8x640xf32, #tpu.memory_space<vmem>>, vector<2x128xf32>
    tpu.vector_store %arg9[%c0_7, %c128], %4 {strides = array<i32>} : memref<8x640xf32, #tpu.memory_space<vmem>>, vector<2x128xf32>,
    %c0_8 = arith.constant 0 : index
    %c0_9 = arith.constant 0 : index
    %6 = vector.load %arg2[%c0_8, %c0_9] : memref<2x3xf32, #tpu.memory_space<vmem>>, vector<2x3xf32>
    %c0_10 = arith.constant 0 : index
    %c256 = arith.constant 256 : index
    %7 = vector.load %arg9[%c0_10, %c256] : memref<8x640xf32, #tpu.memory_space<vmem>>, vector<2x3xf32>
    tpu.vector_store %arg9[%c0_10, %c256], %6 {strides = array<i32>} : memref<8x640xf32, #tpu.memory_space<vmem>>, vector<2x3xf32>,
    %cst_11 = arith.constant 1.000000e+00 : f32
    %8 = vector.broadcast %cst_11 : f32 to vector<8x1xf32>
    %c0_12 = arith.constant 0 : index
    %c259 = arith.constant 259 : index
    %9 = vector.load %arg9[%c0_12, %c259] : memref<8x640xf32, #tpu.memory_space<vmem>>, vector<8x1xf32>
    tpu.vector_store %arg9[%c0_12, %c259], %8 {strides = array<i32>} : memref<8x640xf32, #tpu.memory_space<vmem>>, vector<8x1xf32>,
    %c0_13 = arith.constant 0 : index
    %c0_14 = arith.constant 0 : index
    %10 = vector.load %arg3[%c0_13, %c0_14] : memref<2x64xf32, #tpu.memory_space<vmem>>, vector<2x64xf32>
    %c0_15 = arith.constant 0 : index
    %c384 = arith.constant 384 : index
    %11 = vector.load %arg9[%c0_15, %c384] : memref<8x640xf32, #tpu.memory_space<vmem>>, vector<2x64xf32>
    tpu.vector_store %arg9[%c0_15, %c384], %10 {strides = array<i32>} : memref<8x640xf32, #tpu.memory_space<vmem>>, vector<2x64xf32>,
    %c0_16 = arith.constant 0 : index
    %c0_17 = arith.constant 0 : index
    %12 = vector.load %arg4[%c0_16, %c0_17] : memref<2x64xf32, #tpu.memory_space<vmem>>, vector<2x64xf32>
    %c0_18 = arith.constant 0 : index
    %c512 = arith.constant 512 : index
    %13 = vector.load %arg9[%c0_18, %c512] : memref<8x640xf32, #tpu.memory_space<vmem>>, vector<2x64xf32>
    tpu.vector_store %arg9[%c0_18, %c512], %12 {strides = array<i32>} : memref<8x640xf32, #tpu.memory_space<vmem>>, vector<2x64xf32>,
    %c0_19 = arith.constant 0 : index
    %c0_20 = arith.constant 0 : index
    %14 = vector.load %arg9[%c0_19, %c0_20] : memref<8x640xf32, #tpu.memory_space<vmem>>, vector<8x640xf32>
    %15 = arith.truncf %14 : vector<8x640xf32> to vector<8x640xbf16>
    %c0_21 = arith.constant 0 : index
    %c0_22 = arith.constant 0 : index
    %16 = vector.load %arg5[%c0_21, %c0_22] : memref<640x128xbf16, #tpu.memory_space<vmem>>, vector<640x128xbf16>
    %cst_23 = arith.constant dense<0.000000e+00> : vector<8x128xf32>
    %17 = tpu.matmul %15, %16, %cst_23 {dimension_numbers = #tpu.dot_dimension_numbers<[1], [0], [0], [1], [0, 0, 1, 1], [], []>} : vector<8x640xbf16>, vector<640x128xbf16>, vector<8x128xf32> -> vector<8x128xf32>
    %c0_24 = arith.constant 0 : index
    %c0_25 = arith.constant 0 : index
    %18 = vector.load %arg7[%c0_24, %c0_25] : memref<8x128xf32, #tpu.memory_space<vmem>>, vector<8x128xf32>
    tpu.vector_store %arg7[%c0_24, %c0_25], %17 {strides = array<i32>} : memref<8x128xf32, #tpu.memory_space<vmem>>, vector<8x128xf32>,
    %19 = vector.extract_strided_slice %15 {offsets = [0, 0], sizes = [8, 384], strides = [1, 1]} : vector<8x640xbf16> to vector<8x384xbf16>
    %c0_26 = arith.constant 0 : index
    %c0_27 = arith.constant 0 : index
    %20 = vector.load %arg6[%c0_26, %c0_27] : memref<384x8xbf16, #tpu.memory_space<vmem>>, vector<384x8xbf16>
    %cst_28 = arith.constant dense<0.000000e+00> : vector<8x8xf32>
    %21 = tpu.matmul %19, %20, %cst_28 {dimension_numbers = #tpu.dot_dimension_numbers<[1], [0], [0], [1], [0, 0, 1, 1], [], []>} : vector<8x384xbf16>, vector<384x8xbf16>, vector<8x8xf32> -> vector<8x8xf32>
    %c0_29 = arith.constant 0 : index
    %c0_30 = arith.constant 0 : index
    %22 = vector.load %arg8[%c0_29, %c0_30] : memref<8x8xf32, #tpu.memory_space<vmem>>, vector<8x8xf32>
    tpu.vector_store %arg8[%c0_29, %c0_30], %21 {strides = array<i32>} : memref<8x8xf32, #tpu.memory_space<vmem>>, vector<8x8xf32>,
    return
  }
}

</mosaic_0001>

<bundles_post_ra>
// kernel: regressor_offset_forward.1
= control target key start
LH: loop header
LB: loop body
LE: loop exit
PB: predicated region body
PF: predicated region fallthrough
CT: control target
= control target key end

     0   :  { %14 = vsyncpa [#allocation4], 0  ;;  %s1251_s0 = inlined_call_operand.vmem [shape: f32[2,128], index: 0, kind: input, shape index: {}]   ;;  %s1252_s1 = inlined_call_operand.vmem [shape: f32[2,128], index: 1, kind: input, shape index: {}]   ;;  %s1253_s2 = inlined_call_operand.vmem [shape: f32[2,3], index: 2, kind: input, shape index: {}]   ;;  %s1254_s3 = inlined_call_operand.vmem [shape: f32[2,64], index: 3, kind: input, shape index: {}]   ;;  %s1255_s4 = inlined_call_operand.vmem [shape: f32[2,64], index: 4, kind: input, shape index: {}]   ;;  %s1256_s5 = inlined_call_operand.hbm [shape: bf16[640,128], index: 5, kind: input, shape index: {}]   ;;  %s1257_s6 = inlined_call_operand.hbm [shape: bf16[384,8], index: 6, kind: input, shape index: {}]   ;;  %s1258_s7 = inlined_call_operand.vmem [shape: f32[8,128], index: 7, kind: output, shape index: {0}]   ;;  %s1259_s8 = inlined_call_operand.vmem [shape: f32[8,8], index: 8, kind: output, shape index: {1}]  }
   0x1   :  { %15 = vsyncpa [#allocation6], 0  ;;  %s1118_s27 = smov [#allocation3]   ;;  %s1070_s9 = scalar_lea.hbm %s1256_s5, 5120 }
   0x2   :  { %s31_s28 = sshll.u32 %s1118_s27, 4  ;;  %p1071_p0 = scmp.ne.s32.totalorder %s1256_s5, %s1070_s9  ;;  %s32_s28 = int_to_ptr.vmem [resolvable:$true] %s31_s28 }
   0x3   :  { %p1074_p1 = scmp.lt.u32.totalorder %s1070_s9, %s1256_s5 }
   0x5   :  { %p1076_p2 = pnand %p1074_p1, %p1071_p0 }
   0x7   :  { %1079 = shalt.err (!%p1076_p2)
}
   0x8   :  { %s1080_s14 = scalar_lea.vmem %s32_s28, 5120  ;;  %p1085_p4 = scmp.lt.s32.totalorder %s32_s28, %s32_s28 }
   0x9   :  { %p1081_p3 = scmp.ne.s32.totalorder %s32_s28, %s1080_s14  ;;  %p1086_p5 = scmp.lt.s32.totalorder %s1080_s14, %s1080_s14 }
   0xb   :  { %p1087_p6 = por %p1086_p5, %p1085_p4 }
   0xd   :  { %p1088_p7 = pnand %p1087_p6, %p1081_p3 }
   0xf   :  { %1091 = shalt.err (!%p1088_p7)
}
  0x10   :  { %s1119_s15 = smov 64   ;;  %s1120_s16 = smov 4  }
  0x11   :  { %37 = dma.hbm_to_vmem [thread:$0]  %s1256_s5, 5120, %s32_s28, [#allocation4], %s1119_s15, %s1119_s15, %s1120_s16  }
  0x12   :  { %s1121_s19 = smov [#allocation5]   ;;  %s1092_s23 = scalar_lea.hbm %s1257_s6, 3072 }
  0x13   :  { %s43_s20 = sshll.u32 %s1121_s19, 4  ;;  %p1093_p8 = scmp.ne.s32.totalorder %s1257_s6, %s1092_s23  ;;  %s44_s20 = int_to_ptr.vmem [resolvable:$true] %s43_s20 }
  0x14   :  { %p1096_p9 = scmp.lt.u32.totalorder %s1092_s23, %s1257_s6 }
  0x16   :  { %p1098_p10 = pnand %p1096_p9, %p1093_p8 }
  0x18   :  { %1101 = shalt.err (!%p1098_p10)
}
  0x19   :  { %s1102_s29 = scalar_lea.vmem %s44_s20, 3072  ;;  %p1107_p12 = scmp.lt.s32.totalorder %s44_s20, %s44_s20 }
  0x1a   :  { %p1103_p11 = scmp.ne.s32.totalorder %s44_s20, %s1102_s29  ;;  %p1108_p13 = scmp.lt.s32.totalorder %s1102_s29, %s1102_s29 }
  0x1c   :  { %p1109_p0 = por %p1108_p13, %p1107_p12 }
  0x1e   :  { %p1110_p1 = pnand %p1109_p0, %p1103_p11 }
  0x20   :  { %1113 = shalt.err (!%p1110_p1)
}
  0x21   :  { %49 = dma.hbm_to_vmem [thread:$0]  %s1257_s6, 3072, %s44_s20, [#allocation6], %s1119_s15, %s1119_s15, %s1120_s16  }
  0x22   :  { %1114 = dma.done.wait [#allocation4], 5120  }
  0x23   :  { %1115 = vsyncadd [#allocation4], 4294962176 }
  0x24   :  { %1116 = dma.done.wait [#allocation6], 3072  }
  0x25   :  { %1117 = vsyncadd [#allocation6], 4294964224  ;;  %v1122_v0 = vmov 0.0   ;;  %v1006_v1 = vld [vmem:[#allocation3 + $0x40] sm:$0xff]   ;;  %v1010_v5 = vld [vmem:[#allocation3 + $0x48] sm:$0xff]   ;;  %vm72_vm0 = vcmask 517120  }
  0x26   :  { %58 = vst [vmem:[#allocation2 + $0x8] sm:$0xff] %v1122_v0  ;;  %57 = vst [vmem:[#allocation2] sm:$0xff] %v1122_v0  ;;  %v1007_v2 = vld [vmem:[#allocation3 + $0xc0] sm:$0xff]   ;;  %875 = vmatprep.subr.bf16.mxu0 %v1006_v1  ;;  %v1011_v6 = vld [vmem:[#allocation3 + $0xc8] sm:$0xff]   ;;  %vm67_vm1 = vcmask 17408   ;;  %vm69_vm2 = vcmask 31768  }
  0x27   :  { %59 = vst [vmem:[#allocation2 + $0x10] sm:$0xff] %v1122_v0  ;;  %60 = vst [vmem:[#allocation2 + $0x18] sm:$0xff] %v1122_v0  ;;  %v1008_v3 = vld [vmem:[#allocation3] sm:$0xff]   ;;  %897 = vmatprep.subr.bf16.mxu1 %v1007_v2  ;;  %v1012_v7 = vld [vmem:[#allocation3 + $0x8] sm:$0xff]   ;;  %v1123_v37 = vmov 1.0   ;;  %vm1124_vm3 = vmmov 0  }
  0x28   :  { %61 = vst [vmem:[#allocation2 + $0x20] sm:$0xff] %v1122_v0  ;;  %v1009_v4 = vld [vmem:[#allocation3 + $0x80] sm:$0xff]   ;;  %876 = vmatpush3.bf16.msra.mxu0 %v1008_v3  ;;  %v1013_v8 = vld [vmem:[#allocation3 + $0x88] sm:$0xff]   ;;  %v1014_v9 = vld [vmem:[#allocation3 + $0x50] sm:$0xff]   ;;  %vm799_vm4 = vcmask 64512  }
  0x29   :  { %898 = vmatpush3.bf16.msra.mxu1 %v1009_v4  ;;  %877 = vmatprep.subr.bf16.mxu0 %v1010_v5  ;;  %v1015_v10 = vld [vmem:[#allocation3 + $0xd0] sm:$0xff]   ;;  %v1018_v13 = vld [vmem:[#allocation3 + $0x58] sm:$0xff]   ;;  %v1022_v17 = vld [vmem:[#allocation3 + $0x60] sm:$0xff]  }
  0x2a   :  { %899 = vmatprep.subr.bf16.mxu1 %v1011_v6  ;;  %v1016_v11 = vld [vmem:[#allocation3 + $0x10] sm:$0xff]   ;;  %v1019_v14 = vld [vmem:[#allocation3 + $0xd8] sm:$0xff]   ;;  %v1023_v18 = vld [vmem:[#allocation3 + $0xe0] sm:$0xff]  }
  0x2b   :  { %v1017_v12 = vld [vmem:[#allocation3 + $0x90] sm:$0xff]   ;;  %v1020_v15 = vld [vmem:[#allocation3 + $0x18] sm:$0xff]   ;;  %v1024_v19 = vld [vmem:[#allocation3 + $0x20] sm:$0xff]  }
  0x2c   :  { %878 = vmatpush3.bf16.msra.mxu0 %v1012_v7  ;;  %v1021_v16 = vld [vmem:[#allocation3 + $0x98] sm:$0xff]   ;;  %v1025_v20 = vld [vmem:[#allocation3 + $0xa0] sm:$0xff]   ;;  %v1026_v21 = vld [vmem:[#allocation3 + $0x68] sm:$0xff]  }
  0x2d   :  { %900 = vmatpush3.bf16.msra.mxu1 %v1013_v8  ;;  %879 = vmatprep.subr.bf16.mxu0 %v1014_v9  ;;  %v1027_v22 = vld [vmem:[#allocation3 + $0xe8] sm:$0xff]   ;;  %v1030_v25 = vld [vmem:[#allocation3 + $0x70] sm:$0xff]   ;;  %v1034_v29 = vld [vmem:[#allocation3 + $0x78] sm:$0xff]  }
  0x2e   :  { %901 = vmatprep.subr.bf16.mxu1 %v1015_v10  ;;  %v1028_v23 = vld [vmem:[#allocation3 + $0x28] sm:$0xff]   ;;  %v1031_v26 = vld [vmem:[#allocation3 + $0xf0] sm:$0xff]   ;;  %v1035_v30 = vld [vmem:[#allocation3 + $0xf8] sm:$0xff]  }
  0x2f   :  { %v1029_v24 = vld [vmem:[#allocation3 + $0xa8] sm:$0xff]   ;;  %v1032_v27 = vld [vmem:[#allocation3 + $0x30] sm:$0xff]   ;;  %v1036_v31 = vld [vmem:[#allocation3 + $0x38] sm:$0xff]  }
  0x30   :  { %880 = vmatpush3.bf16.msra.mxu0 %v1016_v11  ;;  %v1033_v28 = vld [vmem:[#allocation3 + $0xb0] sm:$0xff]   ;;  %v1037_v32 = vld [vmem:[#allocation3 + $0xb8] sm:$0xff]   ;;  %v1038_v44 = vld [vmem:[#allocation3 + $0x100] sm:$0xff]  }
  0x31   :  { %902 = vmatpush3.bf16.msra.mxu1 %v1017_v12  ;;  %881 = vmatprep.subr.bf16.mxu0 %v1018_v13  ;;  %v64_v33 = vld [vmem:[%s1252_s1] sm:$0x3]  ;;  %v1045_v46 = vld [vmem:[#allocation5 + $0x40] sm:$0xff]   ;;  %v1039_v49 = vld [vmem:[#allocation3 + $0x108] sm:$0xff]  }
  0x32   :  { %903 = vmatprep.subr.bf16.mxu1 %v1019_v14  ;;  %v71_v34 = vld [vmem:[%s1254_s3] sm:$0x3]  ;;  %65 = vst [vmem:[#allocation2 + $0x8] sm:$0x3] %v64_v33  ;;  %v1046_v48 = vld [vmem:[#allocation5] sm:$0xff]   ;;  %v1048_v50 = vld [vmem:[#allocation5 + $0x48] sm:$0xff]  }
  0x33   :  { %v62_v35 = vld [vmem:[%s1251_s0] sm:$0x3]  ;;  %73 = vst.msk [vmem:[#allocation2 + $0x18] sm:$0x3] %vm72_vm0, %v71_v34  ;;  %v1049_v51 = vld [vmem:[#allocation5 + $0x8] sm:$0xff]   ;;  %v1051_v53 = vld [vmem:[#allocation5 + $0x50] sm:$0xff]  }
  0x34   :  { %882 = vmatpush3.bf16.msra.mxu0 %v1020_v15  ;;  %63 = vst [vmem:[#allocation2] sm:$0x3] %v62_v35  ;;  %v66_v36 = vld [vmem:[%s1253_s2] sm:$0x3]  ;;  %v1040_v54 = vld [vmem:[#allocation3 + $0x110] sm:$0xff]   ;;  %v1057_v59 = vld [vmem:[#allocation5 + $0x60] sm:$0xff]  }
  0x35   :  { %904 = vmatpush3.bf16.msra.mxu1 %v1021_v16  ;;  %883 = vmatprep.subr.bf16.mxu0 %v1022_v17  ;;  %68 = vst.msk [vmem:[#allocation2 + $0x10] sm:$0x3] %vm67_vm1, %v66_v36  ;;  %v74_v52 = vld [vmem:[%s1255_s4] sm:$0x3]  ;;  %v1052_v55 = vld [vmem:[#allocation5 + $0x10] sm:$0xff]   ;;  %v1042_v60 = vld [vmem:[#allocation3 + $0x120] sm:$0xff]  }
  0x36   :  { %905 = vmatprep.subr.bf16.mxu1 %v1023_v18  ;;  %70 = vst.msk [vmem:[#allocation2 + $0x10] sm:$0xff] %vm69_vm2, %v1123_v37  ;;  %v1054_v56 = vld [vmem:[#allocation5 + $0x58] sm:$0xff]   ;;  %v1058_v61 = vld [vmem:[#allocation5 + $0x20] sm:$0xff]   ;;  %v1060_v62 = vld [vmem:[#allocation5 + $0x68] sm:$0xff]  }
  0x37   :  { %75 = vst.msk [vmem:[#allocation2 + $0x20] sm:$0x3] %vm72_vm0, %v74_v52  ;;  %v1041_v57 = vld [vmem:[#allocation3 + $0x118] sm:$0xff]   ;;  %v1043_v63 = vld [vmem:[#allocation3 + $0x128] sm:$0xff]   ;;  %v1063_v2 = vld [vmem:[#allocation5 + $0x70] sm:$0xff]  }
  0x38   :  { %884 = vmatpush3.bf16.msra.mxu0 %v1024_v19  ;;  %v1055_v58 = vld [vmem:[#allocation5 + $0x18] sm:$0xff]   ;;  %v1061_v1 = vld [vmem:[#allocation5 + $0x28] sm:$0xff]   ;;  %v1044_v3 = vld [vmem:[#allocation3 + $0x130] sm:$0xff]  }
  0x39   :  { %906 = vmatpush3.bf16.msra.mxu1 %v1025_v20  ;;  %885 = vmatprep.subr.bf16.mxu0 %v1026_v21  ;;  %v77_v38 = vld [vmem:[#allocation2 + $0x8] sm:$0xff]  ;;  %v1064_v4 = vld [vmem:[#allocation5 + $0x30] sm:$0xff]   ;;  %v1066_v5 = vld [vmem:[#allocation5 + $0x78] sm:$0xff]  }
  0x3a   :  { %907 = vmatprep.subr.bf16.mxu1 %v1027_v22  ;;  %v79_v39 = vld [vmem:[#allocation2 + $0x18] sm:$0xff]  ;;  %v82_v41 = vpack.c.bf16 %v77_v38, %v77_v38  ;;  %v1047_v6 = vld [vmem:[#allocation3 + $0x138] sm:$0xff]   ;;  %v1050_v10 = vld [vmem:[#allocation5 + $0x80] sm:$0xff]  }
  0x3b   :  { %v76_v40 = vld [vmem:[#allocation2] sm:$0xff]  ;;  %v84_v42 = vpack.c.bf16 %v79_v39, %v79_v39  ;;  %v1053_v11 = vld [vmem:[#allocation5 + $0x88] sm:$0xff]   ;;  %v1056_v12 = vld [vmem:[#allocation5 + $0x90] sm:$0xff]  }
  0x3c   :  { %886 = vmatpush3.bf16.msra.mxu0 %v1028_v23  ;;  %v1214_v43 = vpack.c.bf16 %v76_v40, %v76_v40  ;;  %438 = vmatprep.mubr.bf16.mxu0 %v82_v41  ;;  %v1067_v8 = vld [vmem:[#allocation5 + $0x38] sm:$0xff]   ;;  %v1062_v14 = vld [vmem:[#allocation5 + $0xa0] sm:$0xff]   ;;  %v1065_v15 = vld [vmem:[#allocation5 + $0xa8] sm:$0xff]  }
  0x3d   :  { %908 = vmatpush3.bf16.msra.mxu1 %v1029_v24  ;;  %887 = vmatprep.subr.bf16.mxu0 %v1030_v25  ;;  %v78_v45 = vld [vmem:[#allocation2 + $0x10] sm:$0xff]  ;;  %v1059_v13 = vld [vmem:[#allocation5 + $0x98] sm:$0xff]   ;;  %v1068_v16 = vld [vmem:[#allocation5 + $0xb0] sm:$0xff]  }
  0x3e   :  { %909 = vmatprep.subr.bf16.mxu1 %v1031_v26  ;;  %478 = vmatprep.mubr.bf16.mxu1 %v84_v42  ;;  %v1216_v47 = vpack.c.bf16 %v78_v45, %v78_v45  ;;  %v80_v7 = vld [vmem:[#allocation2 + $0x20] sm:$0xff] }
  0x3f   :  { %v85_v9 = vpack.c.bf16 %v80_v7, %v80_v7  ;;  %v1069_v17 = vld [vmem:[#allocation5 + $0xb8] sm:$0xff]  }
  0x40   :  { %888 = vmatpush3.bf16.msra.mxu0 %v1032_v27 }
  0x41   :  { %910 = vmatpush3.bf16.msra.mxu1 %v1033_v28  ;;  %889 = vmatprep.subr.bf16.mxu0 %v1034_v29 }
  0x42   :  { %911 = vmatprep.subr.bf16.mxu1 %v1035_v30 }
  0x44   :  { %890 = vmatpush3.bf16.msra.mxu0 %v1036_v31 }
  0x45   :  { %912 = vmatpush3.bf16.msra.mxu1 %v1037_v32  ;;  %959 = vmatprep.subr.bf16.mxu0 %v1122_v0 }
  0x46   :  { %928 = vmatprep.subr.bf16.mxu1 %v1045_v46 }
  0x47   :  { %439 = vmatmul.mubr.bf16.vlgmr.msra.gmra.mrb[0].mxu0 %v1214_v43 }
  0x48   :  { %479 = vmatmul.mubr.bf16.vlgmr.msra.gmra.mrb[0].mxu1 %v1216_v47  ;;  %960 = vmatpush3.bf16.msra.mxu0 %v1038_v44 }
  0x49   :  { %961 = vmatprep.subr.bf16.mxu0 %v1122_v0  ;;  %929 = vmatpush3.bf16.msra.mxu1 %v1046_v48 }
  0x4a   :  { %930 = vmatprep.subr.bf16.mxu1 %v1048_v50  ;;  %975 = vmatprep.mubr.msk.bf16.mxu0 %vm1124_vm3, %v1122_v0 }
  0x4b   :  { %751 = vmatprep.mubr.bf16.mxu1 %v82_v41 }
  0x4c   :  { %962 = vmatpush3.bf16.msra.mxu0 %v1039_v49 }
  0x4d   :  { %963 = vmatprep.subr.bf16.mxu0 %v1122_v0  ;;  %931 = vmatpush3.bf16.msra.mxu1 %v1049_v51 }
  0x4e   :  { %932 = vmatprep.subr.bf16.mxu1 %v1051_v53 }
  0x50   :  { %964 = vmatpush3.bf16.msra.mxu0 %v1040_v54 }
  0x51   :  { %965 = vmatprep.subr.bf16.mxu0 %v1122_v0  ;;  %933 = vmatpush3.bf16.msra.mxu1 %v1052_v55 }
  0x52   :  { %934 = vmatprep.subr.bf16.mxu1 %v1054_v56 }
  0x54   :  { %966 = vmatpush3.bf16.msra.mxu0 %v1041_v57 }
  0x55   :  { %967 = vmatprep.subr.bf16.mxu0 %v1122_v0  ;;  %935 = vmatpush3.bf16.msra.mxu1 %v1055_v58 }
  0x56   :  { %936 = vmatprep.subr.bf16.mxu1 %v1057_v59 }
  0x58   :  { %968 = vmatpush3.bf16.msra.mxu0 %v1042_v60 }
  0x59   :  { %969 = vmatprep.subr.bf16.mxu0 %v1122_v0  ;;  %937 = vmatpush3.bf16.msra.mxu1 %v1058_v61 }
  0x5a   :  { %938 = vmatprep.subr.bf16.mxu1 %v1060_v62 }
  0x5c   :  { %970 = vmatpush3.bf16.msra.mxu0 %v1043_v63 }
  0x5d   :  { %971 = vmatprep.subr.bf16.mxu0 %v1122_v0  ;;  %939 = vmatpush3.bf16.msra.mxu1 %v1061_v1 }
  0x5e   :  { %940 = vmatprep.subr.bf16.mxu1 %v1063_v2 }
  0x60   :  { %972 = vmatpush3.bf16.msra.mxu0 %v1044_v3 }
  0x61   :  { %973 = vmatprep.subr.bf16.mxu0 %v1122_v0  ;;  %941 = vmatpush3.bf16.msra.mxu1 %v1064_v4 }
  0x62   :  { %942 = vmatprep.subr.bf16.mxu1 %v1066_v5 }
  0x64   :  { %974 = vmatpush3.bf16.msra.mxu0 %v1047_v6 }
  0x65   :  { %979 = vmatprep.subr.bf16.mxu0 %v1122_v0  ;;  %943 = vmatpush3.bf16.msra.mxu1 %v1067_v8 }
  0x67   :  { %976 = vmatmul.mubr.bf16.vlgmr.msra.gmra.mrb[4].mxu0 %v85_v9 }
  0x68   :  { %980 = vmatpush3.bf16.msra.mxu0 %v1050_v10  ;;  %752 = vmatmul.mubr.bf16.vlgmr.msra.gmra.mrb[4].mxu1 %v1214_v43 }
  0x69   :  { %981 = vmatprep.subr.bf16.mxu0 %v1122_v0  ;;  %995 = vmatprep.mubr.msk.bf16.mxu0 %vm1124_vm3, %v1122_v0 }
  0x6c   :  { %982 = vmatpush3.bf16.msra.mxu0 %v1053_v11 }
  0x6d   :  { %983 = vmatprep.subr.bf16.mxu0 %v1122_v0 }
  0x70   :  { %984 = vmatpush3.bf16.msra.mxu0 %v1056_v12 }
  0x71   :  { %985 = vmatprep.subr.bf16.mxu0 %v1122_v0 }
  0x74   :  { %986 = vmatpush3.bf16.msra.mxu0 %v1059_v13 }
  0x75   :  { %987 = vmatprep.subr.bf16.mxu0 %v1122_v0 }
  0x78   :  { %988 = vmatpush3.bf16.msra.mxu0 %v1062_v14 }
  0x79   :  { %989 = vmatprep.subr.bf16.mxu0 %v1122_v0 }
  0x7c   :  { %990 = vmatpush3.bf16.msra.mxu0 %v1065_v15 }
  0x7d   :  { %991 = vmatprep.subr.bf16.mxu0 %v1122_v0 }
  0x80   :  { %992 = vmatpush3.bf16.msra.mxu0 %v1068_v16 }
  0x81   :  { %993 = vmatprep.subr.bf16.mxu0 %v1122_v0 }
  0x84   :  { %994 = vmatpush3.bf16.msra.mxu0 %v1069_v17 }
  0x87   :  { %996 = vmatmul.mubr.bf16.vlgmr.msra.gmra.mrb[8].mxu0 %v1216_v47 }
 0x11a   :  { %v891_v18 = vpop.f32.mrb[0].mxu0 }
 0x11b   :  { %v913_v19 = vpop.f32.mrb[0].mxu1  ;;  %v892_v20 = vpop.f32.mrb[1].mxu0 }
 0x11c   :  { %v893_v21 = vadd.f32 %v892_v20, %v891_v18  ;;  %v914_v22 = vpop.f32.mrb[1].mxu1  ;;  %v894_v23 = vpop.f32.mrb[2].mxu0 }
 0x11d   :  { %v915_v24 = vadd.f32 %v914_v22, %v913_v19  ;;  %v895_v25 = vpop.f32.mrb[3].mxu0  ;;  %v916_v26 = vpop.f32.mrb[2].mxu1 }
 0x11e   :  { %v917_v27 = vpop.f32.mrb[3].mxu1 }
 0x11f   :  { %v481_v28 = vadd.f32 %v915_v24, %v893_v21 }
 0x13a   :  { %v520_v29 = vpop.f32.mrb[4].mxu0 }
 0x13b   :  { %v521_v30 = vadd.f32 %v520_v29, %v481_v28  ;;  %v977_v31 = vpop.f32.mrb[5].mxu0  ;;  %v944_v32 = vpop.f32.mrb[4].mxu1 }
 0x13c   :  { %v523_v33 = vpop.f32.mrb[6].mxu0  ;;  %v945_v0 = vpop.f32.mrb[5].mxu1 }
 0x13d   :  { %526 = vst [vmem:[%s1258_s7] sm:$0xff] %v521_v30  ;;  %v978_v34 = vpop.f32.mrb[7].mxu0  ;;  %v946_v35 = vadd.f32 %v945_v0, %v944_v32  ;;  %v947_v36 = vpop.f32.mrb[6].mxu1 }
 0x13e   :  { %v948_v37 = vpop.f32.mrb[7].mxu1 }
 0x15a   :  { %v793_v38 = vpop.f32.mrb[8].mxu0 }
 0x15b   :  { %v794_v39 = vadd.f32 %v946_v35, %v793_v38  ;;  %v997_v40 = vpop.f32.mrb[9].mxu0 }
 0x15c   :  { %v796_v41 = vpop.f32.mrb[10].mxu0 }
 0x15d   :  { %800 = vst.msk [vmem:[%s1259_s8] sm:$0xff] %vm799_vm4, %v794_v39  ;;  %v998_v42 = vpop.f32.mrb[11].mxu0 }
 0x15e   :  { %809 = vsyncpa [#allocation4], 1 }
 0x15f   :  { %810 = vsyncpa [#allocation6], 1 }

</bundles_post_ra>
